<compile_context>
chip_gen: v7x
topology: tpu7x:2x2x1
jax: 0.10.0
libtpu: 0.0.40
codegen_flags: <defaults>
</compile_context>

<pallas_src>
import functools
import math

import jax
import jax.numpy as jnp
from jax import lax
from jax.experimental import pallas as pl
from jax.experimental.pallas import tpu as pltpu


_VMEM_LIMIT_BYTES = 48 * 1024 * 1024   # <= v7x physical VMEM; plenty for v5e/v6e tiles


def _pick_seq_tile(s, target):
    """Largest tile <= target (halving from target) that divides s, else s (full dim)."""
    t = target
    while t >= 8:
        if s % t == 0:
            return t
        t //= 2
    return s


# ------------------------- fused QKV projection (3 Linears -> 1) -------------------------

def _qkv_kernel(x_ref, w_ref, b_ref, o_ref):
    # x_ref: (1, ts, Hin) f32   w_ref: (1, Hin, N)   b_ref: (1, 1, N) f32
    # o_ref: (1, 1, ts, N)
    y = jnp.dot(x_ref[0].astype(w_ref.dtype), w_ref[0],
                preferred_element_type=jnp.float32) + b_ref[0]
    o_ref[0, 0] = y.astype(o_ref.dtype)


def qkv_projection(x, w_heads, b_heads, out_dtype):
    """Fused per-head QKV projection.

    x:       [B, S, Hin] f32
    w_heads: [3H, Hin, N] compute dtype (q scale already folded in)
    b_heads: [3H, 1, N]   f32
    returns  [B, 3H, S, N]: heads 0..H-1 = q, H..2H-1 = k, 2H..3H-1 = v.
    """
    B, S, Hin = x.shape
    threeH, _, N = w_heads.shape
    ts = _pick_seq_tile(S, 512)
    return pl.pallas_call(
        _qkv_kernel,
        out_shape=jax.ShapeDtypeStruct((B, threeH, S, N), out_dtype),
        grid=(B, S // ts, threeH),
        in_specs=[
            # x block index constant along the innermost head axis -> stays resident
            pl.BlockSpec((1, ts, Hin), lambda b, si, j: (b, si, 0)),
            pl.BlockSpec((1, Hin, N), lambda b, si, j: (j, 0, 0)),
            pl.BlockSpec((1, 1, N), lambda b, si, j: (j, 0, 0)),
        ],
        out_specs=pl.BlockSpec((1, 1, ts, N), lambda b, si, j: (b, j, si, 0)),
        compiler_params=pltpu.CompilerParams(
            dimension_semantics=("parallel", "parallel", "arbitrary"),
            vmem_limit_bytes=_VMEM_LIMIT_BYTES),
    )(x, w_heads, b_heads)


# -------------------- fused attention + output projection (B x q-tiles) --------------------

def _attention_kernel(bias_ref, q_ref, k_ref, v_ref, wo_ref, bo_ref, out_ref,
                      *rest, num_heads, head_dim, approx_recip, output_attentions):
    # bias_ref: (1, 1, S) f32 additive mask bias
    # q_ref:    (1, H, tq, N)     k_ref / v_ref: (1, H, S, N)
    # wo_ref:   (Hd, Hd)          bo_ref: (1, Hd) f32
    # out_ref:  (1, tq, Hd) f32
    # rest:     ([attn_ref (1, H, tq, S) f32,] ctx_ref (tq, Hd) VMEM scratch)
    if output_attentions:
        attn_ref, ctx_ref = rest
    else:
        attn_ref = None
        (ctx_ref,) = rest

    bias = bias_ref[0]                       # (1, S); broadcasts over query rows
    cd = ctx_ref.dtype

    # Static head loop: cross-head state lives in the VMEM ctx scratch (not vregs),
    # and each head's (tq, S) temporaries die at the ctx store below.
    for h in range(num_heads):
        q = q_ref[0, h]                      # (tq, N) -- 1/sqrt(N) folded into wq/bq
        k = k_ref[0, h]                      # (S, N)
        v = v_ref[0, h]                      # (S, N)

        # scores: contract the head dim directly (no k.T copy), f32 accumulation
        s = lax.dot_general(q, k, (((1,), (1,)), ((), ())),
                            preferred_element_type=jnp.float32)           # (tq, S)
        s = s + bias                          # additive mask (no cmp/select per head)
        # numerically-stable softmax, normalization deferred past the p@v matmul
        p = jnp.exp(s - jnp.max(s, axis=-1, keepdims=True))               # unnormalized
        inv = pl.reciprocal(jnp.sum(p, axis=-1, keepdims=True),
                            approx=approx_recip)                          # (tq, 1)
        ctx = lax.dot_general(p.astype(cd), v, (((1,), (0,)), ((), ())),
                              preferred_element_type=jnp.float32)         # (tq, N)
        # scale ctx rows ((tq,N) multiplies) instead of normalizing p ((tq,S))
        ctx_ref[:, h * head_dim:(h + 1) * head_dim] = (ctx * inv).astype(cd)

        if attn_ref is not None:
            attn_ref[0, h] = p * inv          # normalized probs (exact reciprocal here)

    # Output projection: ONE (tq, Hd) @ (Hd, Hd) matmul at full MXU contraction depth.
    out = jnp.dot(ctx_ref[...], wo_ref[...], preferred_element_type=jnp.float32)
    out_ref[0] = (out + bo_ref[...]).astype(out_ref.dtype)
    # Note: fully-masked query rows yield uniform attention (exp(0) everywhere), matching
    # the reference's -1e12 masked_fill + softmax behavior.


def fused_attention(qkv, mask, wo, bo, num_heads, output_attentions, approx_recip,
                    compute_dtype):
    """qkv: [B, 3H, S, N] (compute dtype), mask: [B, S].  Returns out [B,S,Hd] (and attn)."""
    B, threeH, S, N = qkv.shape
    H = num_heads
    Hd = H * N
    tq = _pick_seq_tile(S, 256)

    # mask hoisted to an additive bias, computed once (not per head / per grid step)
    bias = jnp.where(mask == 0, -1e12, 0.0).astype(jnp.float32).reshape(B, 1, S)

    kern = functools.partial(
        _attention_kernel, num_heads=H, head_dim=N,
        approx_recip=approx_recip, output_attentions=output_attentions)

    out_shape = [jax.ShapeDtypeStruct((B, S, Hd), jnp.float32)]
    out_specs = [pl.BlockSpec((1, tq, Hd), lambda b, qi: (b, qi, 0))]
    if output_attentions:
        out_shape.append(jax.ShapeDtypeStruct((B, H, S, S), jnp.float32))
        out_specs.append(pl.BlockSpec((1, H, tq, S), lambda b, qi: (b, 0, qi, 0)))

    res = pl.pallas_call(
        kern,
        out_shape=tuple(out_shape),
        grid=(B, S // tq),
        in_specs=[
            pl.BlockSpec((1, 1, S), lambda b, qi: (b, 0, 0)),          # mask bias
            pl.BlockSpec((1, H, tq, N), lambda b, qi: (b, 0, qi, 0)),  # q heads (tile tq)
            pl.BlockSpec((1, H, S, N), lambda b, qi: (b, 1, 0, 0)),    # k heads (full S)
            pl.BlockSpec((1, H, S, N), lambda b, qi: (b, 2, 0, 0)),    # v heads (full S)
            pl.BlockSpec((Hd, Hd), lambda b, qi: (0, 0)),              # wo (resident)
            pl.BlockSpec((1, Hd), lambda b, qi: (0, 0)),               # bo
        ],
        out_specs=tuple(out_specs),
        scratch_shapes=[pltpu.VMEM((tq, Hd), compute_dtype)],          # per-q-tile context
        compiler_params=pltpu.CompilerParams(
            dimension_semantics=("parallel", "parallel"),
            vmem_limit_bytes=_VMEM_LIMIT_BYTES),
    )(bias, qkv, qkv, qkv, wo, bo.reshape(1, Hd))
    return res if output_attentions else res[0]


# --------------------------------- full forward -----------------------------------

def multi_head_attention(x, mask, params, num_heads, output_attentions=False,
                         compute_dtype=jnp.bfloat16):
    B, S, Hin = x.shape
    Hd = params["wq"].shape[1]
    N = Hd // num_heads
    scale = 1.0 / math.sqrt(N)

    # Fold the 1/sqrt(head_dim) score scale into the q projection (weight AND bias).
    wqkv = jnp.concatenate(
        [params["wq"] * scale, params["wk"], params["wv"]], axis=1)
    bqkv = jnp.concatenate([params["bq"] * scale, params["bk"], params["bv"]], axis=0)

    # Per-head weight layout (3H, Hin, N): head blocks are DMA'd, never lane-sliced in-kernel.
    w_heads = wqkv.reshape(Hin, 3 * num_heads, N).transpose(1, 0, 2).astype(compute_dtype)
    b_heads = bqkv.reshape(3 * num_heads, 1, N)

    qkv = qkv_projection(x, w_heads, b_heads, out_dtype=compute_dtype)   # [B, 3H, S, N]

    # approx reciprocal (EUP) only when we do NOT write attention probs out.
    approx = (compute_dtype != jnp.float32) and (not output_attentions)
    return fused_attention(qkv, mask, params["wo"].astype(compute_dtype), params["bo"],
                           num_heads, output_attentions, approx, compute_dtype)


# ------------------------------- reference (pure JAX) ------------------------------

def reference(x, mask, params, num_heads):
    B, S, Hd = x.shape
    N = Hd // num_heads
    q = (x @ params["wq"] + params["bq"]).reshape(B, S, num_heads, N).transpose(0, 2, 1, 3)
    k = (x @ params["wk"] + params["bk"]).reshape(B, S, num_heads, N).transpose(0, 2, 1, 3)
    v = (x @ params["wv"] + params["bv"]).reshape(B, S, num_heads, N).transpose(0, 2, 1, 3)
    a = jnp.einsum("bhqn,bhkn->bhqk", q, k) / math.sqrt(N)
    a = jnp.where(mask[:, None, None, :] == 0, -1e12, a)
    a = jax.nn.softmax(a, axis=-1)
    o = jnp.einsum("bhqk,bhkn->bhqn", a, v).transpose(0, 2, 1, 3).reshape(B, S, Hd)
    return o @ params["wo"] + params["bo"], a


# ----------------------------------- main ------------------------------------------

def init_params(key, hidden_size):
    """Deterministic Linear init (uniform +-1/sqrt(fan_in)), weights stored as [in, out]."""
    bound = 1.0 / math.sqrt(hidden_size)
    keys = jax.random.split(key, 8)
    p = {}
    for i, name in enumerate(["q", "k", "v", "o"]):
        p[f"w{name}"] = jax.random.uniform(
            keys[2 * i], (hidden_size, hidden_size), jnp.float32, -bound, bound)
        p[f"b{name}"] = jax.random.uniform(
            keys[2 * i + 1], (hidden_size,), jnp.float32, -bound, bound)
    return p


if __name__ == "__main__":
    B, S, HIDDEN, HEADS = 2, 8, 32, 4

    key = jax.random.PRNGKey(0)
    k_x, k_p = jax.random.split(key)
    x = jax.random.normal(k_x, (B, S, HIDDEN), jnp.float32)
    # mask: 1 = attend, 0 = padding (last two positions of batch 1 are padded)
    mask = jnp.ones((B, S), jnp.float32).at[1, -2:].set(0.0)
    params = init_params(k_p, HIDDEN)

    ref_out, ref_attn = reference(x, mask, params, HEADS)

    # Strict correctness check: f32 compute path (exact reciprocal, f32 MXU operands).
    out32, attn32 = multi_head_attention(
        x, mask, params, HEADS, output_attentions=True, compute_dtype=jnp.float32)
    out32 = jax.block_until_ready(out32)
    attn32 = jax.block_until_ready(attn32)
    assert out32.shape == (B, S, HIDDEN)
    assert attn32.shape == (B, HEADS, S, S)
    assert jnp.allclose(out32, ref_out, rtol=1e-4, atol=1e-4), "f32 output mismatch"
    assert jnp.allclose(attn32, ref_attn, rtol=1e-4, atol=1e-4), "f32 attn mismatch"

    # Default performance path: bf16 MXU operands, deferred softmax normalization,
    # approx reciprocal, no attention-prob writeback.
    out = multi_head_attention(x, mask, params, HEADS, output_attentions=False)
    out = jax.block_until_ready(out)
    assert out.shape == (B, S, HIDDEN)
    assert jnp.allclose(out, ref_out, rtol=5e-2, atol=5e-2), "bf16 output mismatch"

    print("KERNEL_OK")
</pallas_src>

<mosaic_0001>
module attributes {stable_mosaic.version = 11 : i64} {
  func.func @_qkv_kernel(%arg0: i32, %arg1: i32, %arg2: i32, %arg3: memref<1x8x32xf32, #tpu.memory_space<vmem>>, %arg4: memref<1x32x8xf32, #tpu.memory_space<vmem>>, %arg5: memref<1x1x8xf32, #tpu.memory_space<vmem>>, %arg6: memref<1x1x8x8xf32, #tpu.memory_space<vmem>>) attributes {dimension_semantics = [#tpu.dimension_semantics<parallel>, #tpu.dimension_semantics<parallel>, #tpu.dimension_semantics<arbitrary>], iteration_bounds = array<i64: 2, 1, 12>, scalar_prefetch = 0 : i64, scratch_operands = 0 : i64, tpu.core_type = #tpu.core_type<tc>, window_params = [{transform_indices = @transform_0, window_bounds = array<i64: 1, 8, 32>}, {transform_indices = @transform_1, window_bounds = array<i64: 1, 32, 8>}, {transform_indices = @transform_2, window_bounds = array<i64: 1, 1, 8>}, {transform_indices = @transform_3, window_bounds = array<i64: 1, 1, 8, 8>}]} {
    %c0 = arith.constant 0 : index
    %c0_0 = arith.constant 0 : index
    %c0_1 = arith.constant 0 : index
    %0 = vector.load %arg3[%c0, %c0_0, %c0_1] : memref<1x8x32xf32, #tpu.memory_space<vmem>>, vector<1x8x32xf32>
    %1 = vector.shape_cast %0 : vector<1x8x32xf32> to vector<8x32xf32>
    %c0_2 = arith.constant 0 : index
    %c0_3 = arith.constant 0 : index
    %c0_4 = arith.constant 0 : index
    %2 = vector.load %arg4[%c0_2, %c0_3, %c0_4] : memref<1x32x8xf32, #tpu.memory_space<vmem>>, vector<1x32x8xf32>
    %3 = vector.shape_cast %2 : vector<1x32x8xf32> to vector<32x8xf32>
    %cst = arith.constant dense<0.000000e+00> : vector<8x8xf32>
    %4 = tpu.matmul %1, %3, %cst {dimension_numbers = #tpu.dot_dimension_numbers<[1], [0], [0], [1], [0, 0, 1, 1], [], []>} : vector<8x32xf32>, vector<32x8xf32>, vector<8x8xf32> -> vector<8x8xf32>
    %c0_5 = arith.constant 0 : index
    %c0_6 = arith.constant 0 : index
    %c0_7 = arith.constant 0 : index
    %5 = vector.load %arg5[%c0_5, %c0_6, %c0_7] : memref<1x1x8xf32, #tpu.memory_space<vmem>>, vector<1x1x8xf32>
    %6 = vector.shape_cast %5 : vector<1x1x8xf32> to vector<1x8xf32>
    %7 = vector.broadcast %6 : vector<1x8xf32> to vector<8x8xf32>
    %8 = arith.addf %4, %7 : vector<8x8xf32>
    %c0_8 = arith.constant 0 : index
    %c0_9 = arith.constant 0 : index
    %c0_10 = arith.constant 0 : index
    %c0_11 = arith.constant 0 : index
    %9 = vector.load %arg6[%c0_8, %c0_9, %c0_10, %c0_11] : memref<1x1x8x8xf32, #tpu.memory_space<vmem>>, vector<1x1x8x8xf32>
    %10 = vector.shape_cast %9 : vector<1x1x8x8xf32> to vector<8x8xf32>
    %11 = vector.shape_cast %8 : vector<8x8xf32> to vector<1x1x8x8xf32>
    tpu.vector_store %arg6[%c0_8, %c0_9, %c0_10, %c0_11], %11 {strides = array<i32>} : memref<1x1x8x8xf32, #tpu.memory_space<vmem>>, vector<1x1x8x8xf32>,
    return
  }
  func.func @transform_0(%arg0: i32, %arg1: i32, %arg2: i32) -> (i32, i32, i32) {
    %c0_i32 = arith.constant 0 : i32
    %c0_i32_0 = arith.constant 0 : i32
    return %arg0, %arg1, %c0_i32 : i32, i32, i32
  }
  func.func @transform_1(%arg0: i32, %arg1: i32, %arg2: i32) -> (i32, i32, i32) {
    %c0_i32 = arith.constant 0 : i32
    %c0_i32_0 = arith.constant 0 : i32
    %c0_i32_1 = arith.constant 0 : i32
    return %arg2, %c0_i32, %c0_i32_0 : i32, i32, i32
  }
  func.func @transform_2(%arg0: i32, %arg1: i32, %arg2: i32) -> (i32, i32, i32) {
    %c0_i32 = arith.constant 0 : i32
    %c0_i32_0 = arith.constant 0 : i32
    %c0_i32_1 = arith.constant 0 : i32
    return %arg2, %c0_i32, %c0_i32_0 : i32, i32, i32
  }
  func.func @transform_3(%arg0: i32, %arg1: i32, %arg2: i32) -> (i32, i32, i32, i32) {
    %c0_i32 = arith.constant 0 : i32
    %c0_i32_0 = arith.constant 0 : i32
    return %arg0, %arg2, %arg1, %c0_i32 : i32, i32, i32, i32
  }
}

</mosaic_0001>

<bundles_post_ra>
// kernel: tpu_custom_call.1
= control target key start
LH: loop header
LB: loop body
LE: loop exit
PB: predicated region body
PF: predicated region fallthrough
CT: control target
= control target key end

     0   :  { %s596_s12 = smov 0   ;;  %s598_s13 = smov 0   ;;  %s653_s0 = inlined_call_operand.vmem [shape: f32[2,8,32], index: 0, kind: input, shape index: {}]   ;;  %s654_s1 = inlined_call_operand.vmem [shape: f32[12,32,8], index: 1, kind: input, shape index: {}]   ;;  %s655_s2 = inlined_call_operand.vmem [shape: f32[12,1,8], index: 2, kind: input, shape index: {}]   ;;  %s656_s3 = inlined_call_operand.vmem [shape: f32[2,12,8,8], index: 3, kind: output, shape index: {}]  }
   0x1   :  { %s600_s14 = smov 0   ;;  %s602_s15 = smov 0  }
   0x2   :  { %s604_s16 = smov 0  }
   0x3 LB: > { %s25_s17 = sadd.s32 1, %s563_s14  ;;  %s32_s18 = sadd.s32 1, %s567_s15  ;;  %s571_s16 = sphi %s604_s16, %s13_s16   ;;  %s567_s15 = sphi %s602_s15, %s660_s15   ;;  %s563_s14 = sphi %s600_s14, %s659_s14   ;;  %s559_s13 = sphi %s598_s13, %s658_s13   ;;  %s555_s12 = sphi %s596_s12, %s657_s12  }
   0x4   : > { %p26_p0 = scmp.ge.s32.totalorder %s25_s17, 12  ;;  %p457_p1 = scmp.ge.s32.totalorder %s571_s16, 1 }
   0x5   : > { %p182_p2 = scmp.lt.s32.totalorder %s571_s16, 25 }
   0x6   : > { %s662_s17 = smov (%p26_p0, %s25_s17), 0  ;;  %s664_s18 = smov (!%p26_p0, %s32_s18), %s567_s15 }
   0x7   : > { %p183_p3 = pnand %p457_p1, %p182_p2  ;;  %p34_p4 = scmp.ge.s32.totalorder %s664_s18, 2 }
   0x8   : > { %p229_p5 = scmp.lt.s32.totalorder (!%p183_p3), %s555_s12, 11  ;;  %p222_p6 = scmp.lt.s32.totalorder (!%p183_p3), %s559_s13, 1  ;;  %v573_v0 = vmov (!%p183_p3), 0.0|0.0   ;;  %vm574_vm0 = vmmov (!%p183_p3), 0   ;;  %v575_v1 = vmov (!%p183_p3), 0.0   ;;  %vm260_vm1 = vcmask (!%p183_p3), 261120  }
   0x9   : > { %s666_s18 = smov (%p34_p4, %s664_s18), 0  ;;  %186 = sbr.rel (%p183_p3) target bundleno = 244 (0xf4), region = 32 }
   0xa   : > { %483 = vmatprep.subr.bf16.mxu0 (!%p183_p3), %v573_v0  ;;  %480 = vmatprep.mubr.msk.f32.mxu0 (!%p183_p3), %vm574_vm0, %v575_v1  ;;  %vm334_vm2 = vcmask (!%p183_p3), 64512  }
  0x10   : > { %s668_s12 = smov (!%p229_p5, %s555_s12), 11  ;;  %s670_s13 = smov (!%p222_p6, %s559_s13), 1 }
  0x11   : > { %s466_s19 = sshll.u32 %s668_s12, 5  ;;  %s489_s23 = smul.u32 12, %s670_s13 }
  0x12   : > { %s233_s22 = scalar_lea.vmem %s654_s1, %s466_s19  ;;  %s458_s24 = sshll.u32 %s670_s13, 3 }
  0x13   : > { %v249_v2 = vld [vmem:[%s233_s22] sm:$0xff]  ;;  %v250_v3 = vld [vmem:[%s233_s22 + $0x8] sm:$0xff]  ;;  %v251_v4 = vld [vmem:[%s233_s22 + $0x10] sm:$0xff]  ;;  %s245_s25 = sadd.s32 %s489_s23, %s668_s12  ;;  %s228_s28 = scalar_lea.vmem %s653_s0, %s458_s24 }
  0x14   : > { %v484_v5 = vpack.c.bf16 %v250_v3, %v249_v2  ;;  %v252_v6 = vld [vmem:[%s233_s22 + $0x18] sm:$0xff]  ;;  %v248_v8 = vld [vmem:[%s228_s28] sm:$0xff]  ;;  %s236_s4 = scalar_lea.vmem %s655_s2, %s668_s12  ;;  %s461_s5 = sshll.u32 %s245_s25, 3 }
  0x15   : > { %v487_v7 = vpack.c.bf16 %v252_v6, %v251_v4  ;;  %v462_v9 = vld [vmem:[%s236_s4] ss:$0 sm:$0xff]  ;;  %s247_s8 = scalar_lea.vmem %s656_s3, %s461_s5 }
  0x16   : > { %485 = vmatpush3.bf16.msra.mxu0 %v484_v5 }
  0x17   : > { %486 = vmatprep.subr.bf16.mxu0 %v573_v0 }
  0x1a   : > { %488 = vmatpush3.bf16.msra.mxu0 %v487_v7 }
  0x1d   : > { %481 = vmatmul.mubr.msk.f32.vlgmr.msra.gmra.mrb[0].mxu0 %vm260_vm1, %v248_v8 }
  0xf0   : > { %v330_v10 = vpop.f32.mrb[0].mxu0 }
  0xf1   : > { %v331_v11 = vadd.f32 %v462_v9, %v330_v10  ;;  %v482_v12 = vpop.f32.mrb[1].mxu0 }
  0xf3   : > { %335 = vst.msk [vmem:[%s247_s8] sm:$0xff] %vm334_vm2, %v331_v11 }
  0xf4 PF: > { %s13_s16 = sadd.s32 1, %s571_s16   ;;  %s657_s12 = smov %s563_s14 }
  0xf5   : > { %p10_p7 = scmp.ge.s32.totalorder %s13_s16, 26   ;;  %s658_s13 = smov %s567_s15 }
  0xf6   : > { %s659_s14 = smov %s662_s17  ;;  %s660_s15 = smov %s666_s18 }
  0xf7   :  { %12 = sbr.rel (!%p10_p7) target bundleno = 3 (0x3), region = 68 }

</bundles_post_ra>
